<compile_context>
chip_gen: v5e
topology: v5e:2x2
jax: 0.10.0
libtpu: 0.0.40
codegen_flags: <defaults>
</compile_context>

<pallas_src>
import functools

import jax
import jax.numpy as jnp
from jax.experimental import pallas as pl
from jax.experimental.pallas import tpu as pltpu


def _round_up(x, n):
    return ((x + n - 1) // n) * n


def _cdiv(a, b):
    return (a + b - 1) // b


def _jigsaw_head_kernel(x_ref, w1_ref, b1_ref, w2_ref, b2_ref, w3_ref, b3_ref,
                        out_ref, *, act_dtype):
    """Fused MLP tile: relu(relu(x@W1+b1)@W2+b2)@W3+b3 for one M-tile.

    Weights arrive already in the MXU dtype (pre-cast in the wrapper); only the
    streamed activations are cast here (they have to be touched anyway).
    """
    x = x_ref[...]
    if act_dtype is not None:
        x = x.astype(act_dtype)

    # Layer 1: MXU matmul (f32 accumulation); bias add + ReLU in f32 on the VPU.
    h = jnp.dot(x, w1_ref[...], preferred_element_type=jnp.float32) + b1_ref[...]
    h = jnp.maximum(h, 0.0)
    if act_dtype is not None:
        h = h.astype(act_dtype)

    # Layer 2.
    h = jnp.dot(h, w2_ref[...], preferred_element_type=jnp.float32) + b2_ref[...]
    h = jnp.maximum(h, 0.0)
    if act_dtype is not None:
        h = h.astype(act_dtype)

    # Layer 3 (output projection; out dim is pre-padded to a 128-lane multiple
    # so this store is a full-lane, unmasked vst).
    h = jnp.dot(h, w3_ref[...], preferred_element_type=jnp.float32) + b3_ref[...]
    out_ref[...] = h.astype(out_ref.dtype)


def _resident_spec(block_shape, index_map):
    """Constant-index (resident) operand: single-buffered if supported."""
    try:
        return pl.BlockSpec(block_shape, index_map, pipeline_mode=pl.Buffered(1))
    except TypeError:  # older JAX without pipeline_mode kwarg
        return pl.BlockSpec(block_shape, index_map)


def jigsaw_head_forward(x, params, *, tile_m=512, matmul_dtype="auto",
                        out_dtype=None, vmem_limit_bytes=None):
    """x: (batch, seq, embed_dim).  params: dict of W (in,out) / b (1,out)."""
    batch, seq, embed_dim = x.shape
    w1, b1, w2, b2, w3, b3 = (params["w1"], params["b1"], params["w2"],
                              params["b2"], params["w3"], params["b3"])
    out_dim = w3.shape[1]

    m = batch * seq
    x2d = x.reshape(m, embed_dim)

    if matmul_dtype == "auto":
        # Tiny feature dims gain nothing from bf16 MXU operands (K,N < 128 are
        # lane-padded regardless); keep exact-f32 numerics there.
        matmul_dtype = None if embed_dim <= 128 else jnp.bfloat16

    # Pre-cast resident weights ONCE (removes per-step VALU cast work, halves
    # resident weight VMEM and the one-time weight HBM fetch).  Biases stay f32
    # (added to the f32 accumulator).
    if matmul_dtype is not None:
        w1 = w1.astype(matmul_dtype)
        w2 = w2.astype(matmul_dtype)
        w3 = w3.astype(matmul_dtype)

    # Lane-dense output: pad the final projection to a multiple of 128 lanes so
    # the per-tile writeback is an unmasked full-lane store.
    n_pad = _round_up(out_dim, 128)
    if n_pad != out_dim:
        w3 = jnp.pad(w3, ((0, 0), (0, n_pad - out_dim)))
        b3 = jnp.pad(b3, ((0, 0), (0, n_pad - out_dim)))

    out_dtype = x.dtype if out_dtype is None else jnp.dtype(out_dtype)
    w_item = jnp.dtype(matmul_dtype).itemsize if matmul_dtype is not None else 4

    # ---- M tiling (no wrapper-side jnp.pad of x; ragged last tile is handled
    # by Pallas boundary blocks; all ops are row-wise independent, so garbage
    # tail rows cannot pollute valid rows and are never written).
    tiny = embed_dim <= 128 and m <= 256
    if tiny:
        tm = _round_up(m, 8)                       # single grid step
    else:
        # >= 2 steps so the "parallel" M axis can shard across both v7x TCs.
        num_steps = max(2, _cdiv(m, tile_m))
        tm = _round_up(_cdiv(m, num_steps), 8)

    # ---- VMEM footprint accounting (v7x has only 64 MiB physical VMEM).
    try:
        phys_vmem = int(pltpu.get_tpu_info().vmem_capacity_bytes)
    except Exception:
        phys_vmem = 64 * 1024 * 1024

    def _footprint(tm_):
        weights = (embed_dim * embed_dim * 2 + embed_dim * n_pad) * w_item  # 1x-buffered
        biases = (2 * embed_dim + n_pad) * 4
        x_buf = 2 * tm_ * embed_dim * x.dtype.itemsize                     # 2x-buffered
        o_buf = 2 * tm_ * n_pad * out_dtype.itemsize                       # 2x-buffered
        interm = tm_ * (2 * embed_dim + n_pad) * 4                         # f32 h1/h2/h3
        if matmul_dtype is not None:
            interm += tm_ * 2 * embed_dim * w_item                         # bf16 act temps
        return weights + biases + x_buf + o_buf + interm

    budget = (phys_vmem * 3) // 4
    while _footprint(tm) > budget and tm > 64:
        tm = max(64, _round_up(tm // 2, 8))

    if vmem_limit_bytes is None:
        vmem_limit_bytes = int(min(max(2 * _footprint(tm) + (8 << 20), 32 << 20),
                                   (phys_vmem * 9) // 10))

    grid = (_cdiv(m, tm),)

    flops = 2 * m * embed_dim * (2 * embed_dim + n_pad)
    bytes_accessed = (
        x2d.size * x2d.dtype.itemsize
        + sum(a.size * a.dtype.itemsize for a in (w1, b1, w2, b2, w3, b3))
        + m * n_pad * out_dtype.itemsize)

    kernel = functools.partial(_jigsaw_head_kernel, act_dtype=matmul_dtype)

    out2d = pl.pallas_call(
        kernel,
        out_shape=jax.ShapeDtypeStruct((m, n_pad), out_dtype),
        grid=grid,
        in_specs=[
            # Streamed activations: new block per grid step (double-buffered).
            pl.BlockSpec((tm, embed_dim), lambda i: (i, 0)),
            # Weights / biases: constant block index -> fetched once, resident,
            # single-buffered.
            _resident_spec((embed_dim, embed_dim), lambda i: (0, 0)),
            _resident_spec((1, embed_dim), lambda i: (0, 0)),
            _resident_spec((embed_dim, embed_dim), lambda i: (0, 0)),
            _resident_spec((1, embed_dim), lambda i: (0, 0)),
            _resident_spec((embed_dim, n_pad), lambda i: (0, 0)),
            _resident_spec((1, n_pad), lambda i: (0, 0)),
        ],
        out_specs=pl.BlockSpec((tm, n_pad), lambda i: (i, 0)),
        compiler_params=pltpu.CompilerParams(
            dimension_semantics=("parallel",),
            vmem_limit_bytes=vmem_limit_bytes),
        cost_estimate=pl.CostEstimate(
            flops=flops, transcendentals=0, bytes_accessed=bytes_accessed),
    )(x2d, w1, b1, w2, b2, w3, b3)

    out = out2d[:, :out_dim].reshape(batch, seq, out_dim)
    # torch's .squeeze(-1): only removes the last axis if it is size 1.
    if out.shape[-1] == 1:
        out = out[..., 0]
    return out


def init_jigsaw_head_params(key, embed_dim, num_patches):
    """nn.Linear-style init (uniform +/- 1/sqrt(fan_in)); W stored as (in, out)."""
    out_dim = num_patches + 4
    dims = [(embed_dim, embed_dim), (embed_dim, embed_dim), (embed_dim, out_dim)]
    params = {}
    for i, (fan_in, fan_out) in enumerate(dims, start=1):
        key, kw, kb = jax.random.split(key, 3)
        bound = 1.0 / (fan_in ** 0.5)
        params[f"w{i}"] = jax.random.uniform(
            kw, (fan_in, fan_out), jnp.float32, minval=-bound, maxval=bound)
        params[f"b{i}"] = jax.random.uniform(
            kb, (1, fan_out), jnp.float32, minval=-bound, maxval=bound)
    return params


def reference_forward(x, params, matmul_dtype=None):
    """Plain-JAX reference (optionally mirroring the kernel's bf16 matmuls)."""
    def mm(a, w):
        if matmul_dtype is not None:
            a = a.astype(matmul_dtype)
            w = w.astype(matmul_dtype)
        return jnp.dot(a, w, preferred_element_type=jnp.float32)

    h = jnp.maximum(mm(x, params["w1"]) + params["b1"][0], 0.0)
    h = jnp.maximum(mm(h, params["w2"]) + params["b2"][0], 0.0)
    out = (mm(h, params["w3"]) + params["b3"][0]).astype(x.dtype)
    if out.shape[-1] == 1:
        out = out[..., 0]
    return out


if __name__ == "__main__":
    # Small shapes consistent with the module:
    #   embed_dim=32, num_patches=12 -> head output dim = 16
    #   x: (batch=2, seq=8, embed_dim=32)
    batch, seq, embed_dim, num_patches = 2, 8, 32, 12

    key = jax.random.PRNGKey(0)
    key, kx = jax.random.split(key)
    x = jax.random.normal(kx, (batch, seq, embed_dim), dtype=jnp.float32)
    params = init_jigsaw_head_params(key, embed_dim, num_patches)

    # Tiny config: "auto" picks exact-f32 matmuls and a single grid step.
    out = jax.block_until_ready(jigsaw_head_forward(x, params))
    ref = reference_forward(x, params, matmul_dtype=None)
    assert out.shape == (batch, seq, num_patches + 4), out.shape
    assert jnp.allclose(out, ref, atol=1e-4, rtol=1e-4), \
        "mismatch vs f32 reference (tiny config)"

    # Larger config exercising the production path: bf16 pre-cast resident
    # weights (single-buffered), >=2 grid steps, ragged last tile (m % tm != 0).
    b2_, s2_, e2_, p2_ = 2, 135, 256, 60
    key, kx2, kp2 = jax.random.split(key, 3)
    x2 = jax.random.normal(kx2, (b2_, s2_, e2_), dtype=jnp.float32)
    params2 = init_jigsaw_head_params(kp2, e2_, p2_)
    out2 = jax.block_until_ready(
        jigsaw_head_forward(x2, params2, matmul_dtype=jnp.bfloat16))
    ref2 = reference_forward(x2, params2, matmul_dtype=jnp.bfloat16)
    assert out2.shape == (b2_, s2_, p2_ + 4), out2.shape
    assert jnp.allclose(out2, ref2, atol=2e-2, rtol=2e-2), \
        "mismatch vs bf16-matched reference (production config)"

    print("KERNEL_OK")
</pallas_src>

<mosaic_0001>
module attributes {stable_mosaic.version = 11 : i64} {
  func.func @_jigsaw_head_kernel(%arg0: i32, %arg1: memref<16x32xf32, #tpu.memory_space<vmem>>, %arg2: memref<32x32xf32, #tpu.memory_space<vmem>>, %arg3: memref<1x32xf32, #tpu.memory_space<vmem>>, %arg4: memref<32x32xf32, #tpu.memory_space<vmem>>, %arg5: memref<1x32xf32, #tpu.memory_space<vmem>>, %arg6: memref<32x128xf32, #tpu.memory_space<vmem>>, %arg7: memref<1x128xf32, #tpu.memory_space<vmem>>, %arg8: memref<16x128xf32, #tpu.memory_space<vmem>>) attributes {dimension_semantics = [#tpu.dimension_semantics<parallel>], iteration_bounds = array<i64: 1>, scalar_prefetch = 0 : i64, scratch_operands = 0 : i64, tpu.core_type = #tpu.core_type<tc>, window_params = [{transform_indices = @transform_0, window_bounds = array<i64: 16, 32>}, {pipeline_mode = #tpu.pipeline_mode<synchronous>, transform_indices = @transform_1, window_bounds = array<i64: 32, 32>}, {pipeline_mode = #tpu.pipeline_mode<synchronous>, transform_indices = @transform_2, window_bounds = array<i64: 1, 32>}, {pipeline_mode = #tpu.pipeline_mode<synchronous>, transform_indices = @transform_3, window_bounds = array<i64: 32, 32>}, {pipeline_mode = #tpu.pipeline_mode<synchronous>, transform_indices = @transform_4, window_bounds = array<i64: 1, 32>}, {pipeline_mode = #tpu.pipeline_mode<synchronous>, transform_indices = @transform_5, window_bounds = array<i64: 32, 128>}, {pipeline_mode = #tpu.pipeline_mode<synchronous>, transform_indices = @transform_6, window_bounds = array<i64: 1, 128>}, {transform_indices = @transform_7, window_bounds = array<i64: 16, 128>}]} {
    %c0 = arith.constant 0 : index
    %c0_0 = arith.constant 0 : index
    %0 = vector.load %arg1[%c0, %c0_0] : memref<16x32xf32, #tpu.memory_space<vmem>>, vector<16x32xf32>
    %c0_1 = arith.constant 0 : index
    %c0_2 = arith.constant 0 : index
    %1 = vector.load %arg2[%c0_1, %c0_2] : memref<32x32xf32, #tpu.memory_space<vmem>>, vector<32x32xf32>
    %cst = arith.constant dense<0.000000e+00> : vector<16x32xf32>
    %2 = tpu.matmul %0, %1, %cst {dimension_numbers = #tpu.dot_dimension_numbers<[1], [0], [0], [1], [0, 0, 1, 1], [], []>} : vector<16x32xf32>, vector<32x32xf32>, vector<16x32xf32> -> vector<16x32xf32>
    %c0_3 = arith.constant 0 : index
    %c0_4 = arith.constant 0 : index
    %3 = vector.load %arg3[%c0_3, %c0_4] : memref<1x32xf32, #tpu.memory_space<vmem>>, vector<1x32xf32>
    %4 = vector.broadcast %3 : vector<1x32xf32> to vector<16x32xf32>
    %5 = arith.addf %2, %4 : vector<16x32xf32>
    %cst_5 = arith.constant 0.000000e+00 : f32
    %6 = vector.broadcast %cst_5 : f32 to vector<16x32xf32>
    %7 = arith.maximumf %5, %6 : vector<16x32xf32>
    %c0_6 = arith.constant 0 : index
    %c0_7 = arith.constant 0 : index
    %8 = vector.load %arg4[%c0_6, %c0_7] : memref<32x32xf32, #tpu.memory_space<vmem>>, vector<32x32xf32>
    %cst_8 = arith.constant dense<0.000000e+00> : vector<16x32xf32>
    %9 = tpu.matmul %7, %8, %cst_8 {dimension_numbers = #tpu.dot_dimension_numbers<[1], [0], [0], [1], [0, 0, 1, 1], [], []>} : vector<16x32xf32>, vector<32x32xf32>, vector<16x32xf32> -> vector<16x32xf32>
    %c0_9 = arith.constant 0 : index
    %c0_10 = arith.constant 0 : index
    %10 = vector.load %arg5[%c0_9, %c0_10] : memref<1x32xf32, #tpu.memory_space<vmem>>, vector<1x32xf32>
    %11 = vector.broadcast %10 : vector<1x32xf32> to vector<16x32xf32>
    %12 = arith.addf %9, %11 : vector<16x32xf32>
    %cst_11 = arith.constant 0.000000e+00 : f32
    %13 = vector.broadcast %cst_11 : f32 to vector<16x32xf32>
    %14 = arith.maximumf %12, %13 : vector<16x32xf32>
    %c0_12 = arith.constant 0 : index
    %c0_13 = arith.constant 0 : index
    %15 = vector.load %arg6[%c0_12, %c0_13] : memref<32x128xf32, #tpu.memory_space<vmem>>, vector<32x128xf32>
    %cst_14 = arith.constant dense<0.000000e+00> : vector<16x128xf32>
    %16 = tpu.matmul %14, %15, %cst_14 {dimension_numbers = #tpu.dot_dimension_numbers<[1], [0], [0], [1], [0, 0, 1, 1], [], []>} : vector<16x32xf32>, vector<32x128xf32>, vector<16x128xf32> -> vector<16x128xf32>
    %c0_15 = arith.constant 0 : index
    %c0_16 = arith.constant 0 : index
    %17 = vector.load %arg7[%c0_15, %c0_16] : memref<1x128xf32, #tpu.memory_space<vmem>>, vector<1x128xf32>
    %18 = vector.broadcast %17 : vector<1x128xf32> to vector<16x128xf32>
    %19 = arith.addf %16, %18 : vector<16x128xf32>
    %c0_17 = arith.constant 0 : index
    %c0_18 = arith.constant 0 : index
    %20 = vector.load %arg8[%c0_17, %c0_18] : memref<16x128xf32, #tpu.memory_space<vmem>>, vector<16x128xf32>
    tpu.vector_store %arg8[%c0_17, %c0_18], %19 {strides = array<i32>} : memref<16x128xf32, #tpu.memory_space<vmem>>, vector<16x128xf32>,
    return
  }
  func.func @transform_0(%arg0: i32) -> (i32, i32) {
    %c0_i32 = arith.constant 0 : i32
    %c0_i32_0 = arith.constant 0 : i32
    return %arg0, %c0_i32 : i32, i32
  }
  func.func @transform_1(%arg0: i32) -> (i32, i32) {
    %c0_i32 = arith.constant 0 : i32
    %c0_i32_0 = arith.constant 0 : i32
    %c0_i32_1 = arith.constant 0 : i32
    return %c0_i32, %c0_i32_0 : i32, i32
  }
  func.func @transform_2(%arg0: i32) -> (i32, i32) {
    %c0_i32 = arith.constant 0 : i32
    %c0_i32_0 = arith.constant 0 : i32
    %c0_i32_1 = arith.constant 0 : i32
    return %c0_i32, %c0_i32_0 : i32, i32
  }
  func.func @transform_3(%arg0: i32) -> (i32, i32) {
    %c0_i32 = arith.constant 0 : i32
    %c0_i32_0 = arith.constant 0 : i32
    %c0_i32_1 = arith.constant 0 : i32
    return %c0_i32, %c0_i32_0 : i32, i32
  }
  func.func @transform_4(%arg0: i32) -> (i32, i32) {
    %c0_i32 = arith.constant 0 : i32
    %c0_i32_0 = arith.constant 0 : i32
    %c0_i32_1 = arith.constant 0 : i32
    return %c0_i32, %c0_i32_0 : i32, i32
  }
  func.func @transform_5(%arg0: i32) -> (i32, i32) {
    %c0_i32 = arith.constant 0 : i32
    %c0_i32_0 = arith.constant 0 : i32
    %c0_i32_1 = arith.constant 0 : i32
    return %c0_i32, %c0_i32_0 : i32, i32
  }
  func.func @transform_6(%arg0: i32) -> (i32, i32) {
    %c0_i32 = arith.constant 0 : i32
    %c0_i32_0 = arith.constant 0 : i32
    %c0_i32_1 = arith.constant 0 : i32
    return %c0_i32, %c0_i32_0 : i32, i32
  }
  func.func @transform_7(%arg0: i32) -> (i32, i32) {
    %c0_i32 = arith.constant 0 : i32
    %c0_i32_0 = arith.constant 0 : i32
    return %arg0, %c0_i32 : i32, i32
  }
}

</mosaic_0001>

<bundles_post_ra>
// kernel: tpu_custom_call.1
= control target key start
LH: loop header
LB: loop body
LE: loop exit
PB: predicated region body
PF: predicated region fallthrough
CT: control target
= control target key end

     0   :  { %12 = vsyncpa [#allocation3], 0  ;;  %s471_s0 = inlined_call_operand.hbm [shape: f32[16,32], index: 0, kind: input, shape index: {}]   ;;  %s472_s1 = inlined_call_operand.hbm [shape: f32[32,32], index: 1, kind: input, shape index: {}]   ;;  %s473_s2 = inlined_call_operand.vmem [shape: f32[1,32], index: 2, kind: input, shape index: {}]   ;;  %s474_s3 = inlined_call_operand.hbm [shape: f32[32,32], index: 3, kind: input, shape index: {}]   ;;  %s475_s4 = inlined_call_operand.vmem [shape: f32[1,32], index: 4, kind: input, shape index: {}]   ;;  %s476_s5 = inlined_call_operand.hbm [shape: f32[32,128], index: 5, kind: input, shape index: {}]   ;;  %s477_s6 = inlined_call_operand.vmem [shape: f32[1,128], index: 6, kind: input, shape index: {}]   ;;  %s478_s7 = inlined_call_operand.hbm [shape: f32[16,128], index: 7, kind: output, shape index: {}]  }
   0x1   :  { %13 = vsyncpa [#allocation6], 0 }
   0x2   :  { %14 = vsyncpa [#allocation9], 0 }
   0x3   :  { %15 = vsyncpa [#allocation4], 0  ;;  %s33_s26 = sshll.u32 %s472_s1, 4  ;;  %s379_s27 = smov [#allocation5]   ;;  %s34_s26 = int_to_ptr.hbm [resolvable:$true] %s33_s26 }
   0x4   :  { %s35_s28 = sshll.u32 %s379_s27, 4  ;;  %s20_s8 = sshll.u32 %s471_s0, 4  ;;  %s36_s28 = int_to_ptr.vmem [resolvable:$true] %s35_s28  ;;  %s21_s8 = int_to_ptr.hbm [resolvable:$true] %s20_s8 }
   0x5   :  { %s380_s9 = smov 128   ;;  %s381_s10 = smov 8  }
   0x6   :  { %41 = dma.hbm_to_vmem [thread:$0]  %s34_s26, 512, %s36_s28, [#allocation6], %s380_s9, %s380_s9, %s381_s10  }
   0x7   :  { %s382_s11 = smov [#allocation2]   ;;  %s48_s1 = sshll.u32 %s474_s3, 4  ;;  %s49_s1 = int_to_ptr.hbm [resolvable:$true] %s48_s1 }
   0x8   :  { %s22_s12 = sshll.u32 %s382_s11, 4  ;;  %s63_s16 = sshll.u32 %s476_s5, 4  ;;  %s23_s12 = int_to_ptr.vmem [resolvable:$true] %s22_s12  ;;  %s64_s16 = int_to_ptr.hbm [resolvable:$true] %s63_s16 }
   0x9   :  { %28 = dma.hbm_to_vmem [thread:$0]  %s21_s8, 256, %s23_s12, [#allocation3], %s380_s9, %s380_s9, %s381_s10  }
   0xa   :  { %s383_s17 = smov [#allocation7]   ;;  %s384_s19 = smov [#allocation8]  }
   0xb   :  { %s50_s18 = sshll.u32 %s383_s17, 4  ;;  %s65_s3 = sshll.u32 %s384_s19, 4  ;;  %s51_s18 = int_to_ptr.vmem [resolvable:$true] %s50_s18  ;;  %s66_s3 = int_to_ptr.vmem [resolvable:$true] %s65_s3 }
   0xc   :  { %56 = dma.hbm_to_vmem [thread:$0]  %s49_s1, 512, %s51_s18, [#allocation6], %s380_s9, %s380_s9, %s381_s10  }
   0xd   :  { %71 = dma.hbm_to_vmem [thread:$0]  %s64_s16, 512, %s66_s3, [#allocation9], %s380_s9, %s380_s9, %s381_s10  }
   0xe   :  { %371 = dma.done.wait [#allocation3], 256  }
   0xf   :  { %372 = vsyncadd [#allocation3], 4294967040 }
  0x10   :  { %373 = dma.done.wait [#allocation6], 1024  }
  0x11   :  { %374 = vsyncadd [#allocation6], 4294966272 }
  0x12   :  { %375 = dma.done.wait [#allocation9], 512  }
  0x13   :  { %376 = vsyncadd [#allocation9], 4294966784  ;;  %v95_v0 = vld [vmem:[#allocation5 + $0x18] sm:$0xff]  ;;  %v94_v1 = vld [vmem:[#allocation5 + $0x10] sm:$0xff]  ;;  %vm100_vm0 = vcmask 261120   ;;  %s385_s24 = smov [#allocation10]  }
  0x14   :  { %119 = vmatpush.msra.mxu0 %v95_v0  ;;  %237 = vmatpush.msra.mxu3 %v95_v0  ;;  %v93_v2 = vld [vmem:[#allocation5 + $0x8] sm:$0xff]  ;;  %v135_v3 = vld [vmem:[#allocation7 + $0x18] sm:$0xff]  ;;  %v92_v4 = vld [vmem:[#allocation5] sm:$0xff]  ;;  %s214_s25 = sshll.u32 %s385_s24, 4  ;;  %s216_s27 = sshll.u32 %s478_s7, 4  ;;  %s215_s25 = int_to_ptr.vmem [resolvable:$true] %s214_s25  ;;  %s217_s27 = int_to_ptr.hbm [resolvable:$true] %s216_s27 }
  0x15   :  { %158 = vmatpush.msra.mxu1 %v135_v3  ;;  %v90_v5 = vld [vmem:[#allocation2] sm:$0xff]  ;;  %v91_v6 = vld [vmem:[#allocation2 + $0x8] sm:$0xff]  ;;  %v133_v8 = vld [vmem:[#allocation7 + $0x8] sm:$0xff] }
  0x16   :  { %120 = vmatpush.msra.mxu0 %v94_v1  ;;  %238 = vmatpush.msra.mxu3 %v94_v1  ;;  %v134_v7 = vld [vmem:[#allocation7 + $0x10] sm:$0xff]  ;;  %v132_v9 = vld [vmem:[#allocation7] sm:$0xff]  ;;  %v174_v10 = vld [vmem:[#allocation8 + $0x18] sm:$0xff] }
  0x17   :  { %159 = vmatpush.msra.mxu1 %v134_v7  ;;  %197 = vmatpush.msra.mxu2 %v174_v10  ;;  %v248_v11 = vld [vmem:[%s473_s2] ss:$0 sm:$0xff]  ;;  %v172_v19 = vld [vmem:[#allocation8 + $0x8] sm:$0xff]  ;;  %v171_v20 = vld [vmem:[#allocation8] sm:$0xff] }
  0x18   :  { %121 = vmatpush.msra.mxu0 %v93_v2  ;;  %239 = vmatpush.msra.mxu3 %v93_v2  ;;  %v173_v18 = vld [vmem:[#allocation8 + $0x10] sm:$0xff] }
  0x19   :  { %160 = vmatpush.msra.mxu1 %v133_v8  ;;  %198 = vmatpush.msra.mxu2 %v173_v18  ;;  %v249_v21 = vld [vmem:[%s475_s4] ss:$0 sm:$0xff] }
  0x1a   :  { %122 = vmatpush.msra.mxu0 %v92_v4  ;;  %240 = vmatpush.msra.mxu3 %v92_v4  ;;  %v250_v28 = vld [vmem:[%s477_s6] ss:$0 sm:$0xff] }
  0x1b   :  { %231 = vmatmul.msk.f32.vlgmr.msra.gmra.mxu0 %vm100_vm0, %v90_v5  ;;  %232 = vmatmul.msk.f32.vlgmr.msra.gmra.mxu3 %vm100_vm0, %v91_v6 }
  0x1c   :  { %161 = vmatpush.msra.mxu1 %v132_v9  ;;  %199 = vmatpush.msra.mxu2 %v172_v19 }
  0x1e   :  { %200 = vmatpush.msra.mxu2 %v171_v20 }
  0x98   :  { %v124_v12 = vpop.f32.mrf.mxu0 }
  0x99   :  { %v125_v13 = vadd.f32 %v248_v11, %v124_v12 }
  0x9b   :  { %v130_v14 = vmax.f32 %v125_v13, 0.0 }
  0x9d   :  { %233 = vmatmul.msk.f32.vlgmr.msra.gmra.mxu1 %vm100_vm0, %v130_v14 }
  0x9e   :  { %v127_v15 = vpop.f32.mrf.mxu3 }
  0x9f   :  { %v128_v16 = vadd.f32 %v248_v11, %v127_v15 }
  0xa1   :  { %v131_v17 = vmax.f32 %v128_v16, 0.0 }
  0xa5   :  { %234 = vmatmul.msk.f32.gmra.mxu1 %vm100_vm0, %v131_v17 }
 0x11a   :  { %v163_v22 = vpop.f32.mrf.mxu1 }
 0x11b   :  { %v164_v23 = vadd.f32 %v249_v21, %v163_v22 }
 0x11d   :  { %v169_v24 = vmax.f32 %v164_v23, 0.0 }
 0x11f   :  { %235 = vmatmul.msk.f32.vlgmr.msra.gmra.mxu2 %vm100_vm0, %v169_v24 }
 0x122   :  { %v166_v25 = vpop.f32.mrf.mxu1 }
 0x123   :  { %v167_v26 = vadd.f32 %v249_v21, %v166_v25 }
 0x125   :  { %v170_v27 = vmax.f32 %v167_v26, 0.0 }
 0x127   :  { %236 = vmatmul.msk.f32.gmra.mxu2 %vm100_vm0, %v170_v27 }
 0x1a2   :  { %v202_v29 = vpop.f32.mrf.mxu2 }
 0x1a3   :  { %v203_v30 = vadd.f32 %v250_v28, %v202_v29 }
 0x1a5   :  { %208 = vst [vmem:[#allocation10] sm:$0xff] %v203_v30 }
 0x1aa   :  { %v205_v31 = vpop.f32.mrf.mxu2 }
 0x1ab   :  { %v206_v32 = vadd.f32 %v250_v28, %v205_v31 }
 0x1ad   :  { %209 = vst [vmem:[#allocation10 + $0x8] sm:$0xff] %v206_v32 }
 0x1ae   :  { %222 = dma.vmem_to_hbm [thread:$0]  %s215_s25, 256, %s217_s27, [#allocation4], %s380_s9, %s380_s9, %s381_s10  }
 0x1af   :  { %377 = dma.done.wait [#allocation4], 256  }
 0x1b0   :  { %378 = vsyncadd [#allocation4], 4294967040 }
 0x1b1   :  { %227 = vsyncpa [#allocation3], 1 }
 0x1b2   :  { %228 = vsyncpa [#allocation6], 1 }
 0x1b3   :  { %229 = vsyncpa [#allocation9], 1 }
 0x1b4   :  { %230 = vsyncpa [#allocation4], 1 }

</bundles_post_ra>
